<compile_context>
chip_gen: v5e
topology: v5e:2x2
jax: 0.10.0
libtpu: 0.0.40
codegen_flags: <defaults>
</compile_context>

<pallas_src>
import math

import jax
import jax.numpy as jnp
from jax.experimental import pallas as pl
from jax.experimental.pallas import tpu as pltpu

FEAT_PAD = 128                                   # lane-padded feature width
NUM_LAYERS = 5
LAYER_DIMS = [(42, 42), (42, 35), (35, 24), (24, 14), (14, 7)]  # (in, out)


def _mlp_kernel(x_ref, w_ref, b_ref, o_ref):
    # x_ref: (tile, 128)   w_ref: (5, 128, 128)   b_ref: (8, 128)
    b = b_ref[...]                                # one tile, all 5 biases
    h = x_ref[...]                                # 20x scale folded into W1
    h = jnp.maximum(
        jnp.dot(h, w_ref[0], preferred_element_type=jnp.float32) + b[0:1], 0.0)
    h = jnp.maximum(
        jnp.dot(h, w_ref[1], preferred_element_type=jnp.float32) + b[1:2], 0.0)
    h = jnp.maximum(
        jnp.dot(h, w_ref[2], preferred_element_type=jnp.float32) + b[2:3], 0.0)
    h = jnp.maximum(
        jnp.dot(h, w_ref[3], preferred_element_type=jnp.float32) + b[3:4], 0.0)
    # fc5: no ReLU
    o_ref[...] = (
        jnp.dot(h, w_ref[4], preferred_element_type=jnp.float32) + b[4:5])


@jax.jit
def _net_forward_jit(boards, w_stack, b_pack):
    """boards: (B, 7, 6) f32 -> (B, 7) f32."""
    B = boards.shape[0]
    flat = boards.reshape(B, 42)

    # Batch tile: 128 rows per grid step for large batches; for small batches
    # a single sublane-aligned tile covering the whole (padded) batch.
    if B >= 128:
        tile = 128
    else:
        tile = max(8, ((B + 7) // 8) * 8)
    b_pad = ((B + tile - 1) // tile) * tile

    x = jnp.zeros((b_pad, FEAT_PAD), jnp.float32).at[:B, :42].set(flat)

    out = pl.pallas_call(
        _mlp_kernel,
        out_shape=jax.ShapeDtypeStruct((b_pad, FEAT_PAD), jnp.float32),
        grid=(b_pad // tile,),
        in_specs=[
            pl.BlockSpec((tile, FEAT_PAD), lambda i: (i, 0)),
            # Weights / biases: same block for every grid step -> VMEM-resident,
            # DMA'd once per call regardless of batch size.
            pl.BlockSpec((NUM_LAYERS, FEAT_PAD, FEAT_PAD), lambda i: (0, 0, 0)),
            pl.BlockSpec((8, FEAT_PAD), lambda i: (0, 0)),
        ],
        out_specs=pl.BlockSpec((tile, FEAT_PAD), lambda i: (i, 0)),
        compiler_params=pltpu.CompilerParams(
            dimension_semantics=("parallel",)),
    )(x, w_stack, b_pack)

    return out[:B, :7]


def net_forward(boards, params):
    """boards: (7, 6) or (B, 7, 6). Returns (7,) or (B, 7) fc5 outputs."""
    boards = jnp.asarray(boards, jnp.float32)
    single = boards.ndim == 2
    if single:
        boards = boards[None]
    out = _net_forward_jit(boards, params["w_stack"], params["b_pack"])
    return out[0] if single else out


def init_params(key):
    """Deterministic recreation of the module's init:
    kaiming_uniform_(weight)  (fan_in mode, a=0 -> bound = sqrt(6/fan_in)),
    bias filled with 0.02.

    Kernel layout: weights transposed to (in, out), zero-padded to (128, 128),
    stacked into (5, 128, 128); W1 pre-scaled by 20 (the forward() input scale
    is folded in).  Biases packed one-per-sublane-row into a single (8, 128)
    tile.  Raw (out, in) weights are kept for the plain-JAX reference."""
    w_stack = jnp.zeros((NUM_LAYERS, FEAT_PAD, FEAT_PAD), jnp.float32)
    b_pack = jnp.zeros((8, FEAT_PAD), jnp.float32)
    raw = []
    for li, (fan_in, fan_out) in enumerate(LAYER_DIMS):
        key, sub = jax.random.split(key)
        bound = math.sqrt(6.0 / fan_in)
        # PyTorch weight is (out, in); generate in that layout then transpose.
        w = jax.random.uniform(sub, (fan_out, fan_in), jnp.float32,
                               minval=-bound, maxval=bound)
        b = jnp.full((fan_out,), 0.02, jnp.float32)
        raw.append((w, b))
        w_t = w.T                                  # (in, out)
        if li == 0:
            w_t = w_t * 20.0                       # fold the 20x input scale
        w_stack = w_stack.at[li, :fan_in, :fan_out].set(w_t)
        b_pack = b_pack.at[li, :fan_out].set(b)
    return {"w_stack": w_stack, "b_pack": b_pack, "raw": raw}


def _reference_forward(boards, params):
    """Plain-JAX reference mirroring the PyTorch forward (x = 20 * board)."""
    boards = jnp.asarray(boards, jnp.float32)
    x = boards.reshape(boards.shape[0], 42) * 20.0
    for i, (w, b) in enumerate(params["raw"]):
        x = x @ w.T + b
        if i < NUM_LAYERS - 1:
            x = jnp.maximum(x, 0.0)
    return x


if __name__ == "__main__":
    key = jax.random.PRNGKey(0)
    pkey, bkey = jax.random.split(key)
    params = init_params(pkey)

    # Deterministic batch of 4 example boards: 7 rows x 6 cols in {-1, 0, 1}
    # (typical Connect-4 encoding).
    boards = jax.random.randint(bkey, (4, 7, 6), -1, 2).astype(jnp.float32)

    out = net_forward(boards, params)
    out = jax.block_until_ready(out)
    ref = _reference_forward(boards, params)
    assert out.shape == (4, 7)
    assert jnp.allclose(out, ref, atol=1e-4, rtol=1e-4), (out, ref)

    # Single-board path (matches the module's per-board forward()).
    out1 = jax.block_until_ready(net_forward(boards[0], params))
    assert out1.shape == (7,)
    assert jnp.allclose(out1, ref[0], atol=1e-4, rtol=1e-4), (out1, ref[0])

    print("KERNEL_OK")
</pallas_src>

<mosaic_0001>
module attributes {stable_mosaic.version = 11 : i64} {
  func.func @_mlp_kernel(%arg0: i32, %arg1: memref<8x128xf32, #tpu.memory_space<vmem>>, %arg2: memref<5x128x128xf32, #tpu.memory_space<vmem>>, %arg3: memref<8x128xf32, #tpu.memory_space<vmem>>, %arg4: memref<8x128xf32, #tpu.memory_space<vmem>>) attributes {dimension_semantics = [#tpu.dimension_semantics<parallel>], iteration_bounds = array<i64: 1>, scalar_prefetch = 0 : i64, scratch_operands = 0 : i64, tpu.core_type = #tpu.core_type<tc>, window_params = [{transform_indices = @transform_0, window_bounds = array<i64: 8, 128>}, {pipeline_mode = #tpu.pipeline_mode<synchronous>, transform_indices = @transform_1, window_bounds = array<i64: 5, 128, 128>}, {pipeline_mode = #tpu.pipeline_mode<synchronous>, transform_indices = @transform_2, window_bounds = array<i64: 8, 128>}, {transform_indices = @transform_3, window_bounds = array<i64: 8, 128>}]} {
    %c0 = arith.constant 0 : index
    %c0_0 = arith.constant 0 : index
    %0 = vector.load %arg3[%c0, %c0_0] : memref<8x128xf32, #tpu.memory_space<vmem>>, vector<8x128xf32>
    %c0_1 = arith.constant 0 : index
    %c0_2 = arith.constant 0 : index
    %1 = vector.load %arg1[%c0_1, %c0_2] : memref<8x128xf32, #tpu.memory_space<vmem>>, vector<8x128xf32>
    %c0_3 = arith.constant 0 : index
    %c0_4 = arith.constant 0 : index
    %c0_5 = arith.constant 0 : index
    %2 = vector.load %arg2[%c0_3, %c0_4, %c0_5] : memref<5x128x128xf32, #tpu.memory_space<vmem>>, vector<1x128x128xf32>
    %3 = vector.shape_cast %2 : vector<1x128x128xf32> to vector<128x128xf32>
    %cst = arith.constant dense<0.000000e+00> : vector<8x128xf32>
    %4 = tpu.matmul %1, %3, %cst {dimension_numbers = #tpu.dot_dimension_numbers<[1], [0], [0], [1], [0, 0, 1, 1], [], []>} : vector<8x128xf32>, vector<128x128xf32>, vector<8x128xf32> -> vector<8x128xf32>
    %5 = vector.extract_strided_slice %0 {offsets = [0, 0], sizes = [1, 128], strides = [1, 1]} : vector<8x128xf32> to vector<1x128xf32>
    %6 = vector.broadcast %5 : vector<1x128xf32> to vector<8x128xf32>
    %7 = arith.addf %4, %6 : vector<8x128xf32>
    %cst_6 = arith.constant 0.000000e+00 : f32
    %8 = vector.broadcast %cst_6 : f32 to vector<8x128xf32>
    %9 = arith.maximumf %7, %8 : vector<8x128xf32>
    %c1 = arith.constant 1 : index
    %c0_7 = arith.constant 0 : index
    %c0_8 = arith.constant 0 : index
    %10 = vector.load %arg2[%c1, %c0_7, %c0_8] : memref<5x128x128xf32, #tpu.memory_space<vmem>>, vector<1x128x128xf32>
    %11 = vector.shape_cast %10 : vector<1x128x128xf32> to vector<128x128xf32>
    %cst_9 = arith.constant dense<0.000000e+00> : vector<8x128xf32>
    %12 = tpu.matmul %9, %11, %cst_9 {dimension_numbers = #tpu.dot_dimension_numbers<[1], [0], [0], [1], [0, 0, 1, 1], [], []>} : vector<8x128xf32>, vector<128x128xf32>, vector<8x128xf32> -> vector<8x128xf32>
    %13 = vector.extract_strided_slice %0 {offsets = [1, 0], sizes = [1, 128], strides = [1, 1]} : vector<8x128xf32> to vector<1x128xf32>
    %14 = vector.broadcast %13 : vector<1x128xf32> to vector<8x128xf32>
    %15 = arith.addf %12, %14 : vector<8x128xf32>
    %cst_10 = arith.constant 0.000000e+00 : f32
    %16 = vector.broadcast %cst_10 : f32 to vector<8x128xf32>
    %17 = arith.maximumf %15, %16 : vector<8x128xf32>
    %c2 = arith.constant 2 : index
    %c0_11 = arith.constant 0 : index
    %c0_12 = arith.constant 0 : index
    %18 = vector.load %arg2[%c2, %c0_11, %c0_12] : memref<5x128x128xf32, #tpu.memory_space<vmem>>, vector<1x128x128xf32>
    %19 = vector.shape_cast %18 : vector<1x128x128xf32> to vector<128x128xf32>
    %cst_13 = arith.constant dense<0.000000e+00> : vector<8x128xf32>
    %20 = tpu.matmul %17, %19, %cst_13 {dimension_numbers = #tpu.dot_dimension_numbers<[1], [0], [0], [1], [0, 0, 1, 1], [], []>} : vector<8x128xf32>, vector<128x128xf32>, vector<8x128xf32> -> vector<8x128xf32>
    %21 = vector.extract_strided_slice %0 {offsets = [2, 0], sizes = [1, 128], strides = [1, 1]} : vector<8x128xf32> to vector<1x128xf32>
    %22 = vector.broadcast %21 : vector<1x128xf32> to vector<8x128xf32>
    %23 = arith.addf %20, %22 : vector<8x128xf32>
    %cst_14 = arith.constant 0.000000e+00 : f32
    %24 = vector.broadcast %cst_14 : f32 to vector<8x128xf32>
    %25 = arith.maximumf %23, %24 : vector<8x128xf32>
    %c3 = arith.constant 3 : index
    %c0_15 = arith.constant 0 : index
    %c0_16 = arith.constant 0 : index
    %26 = vector.load %arg2[%c3, %c0_15, %c0_16] : memref<5x128x128xf32, #tpu.memory_space<vmem>>, vector<1x128x128xf32>
    %27 = vector.shape_cast %26 : vector<1x128x128xf32> to vector<128x128xf32>
    %cst_17 = arith.constant dense<0.000000e+00> : vector<8x128xf32>
    %28 = tpu.matmul %25, %27, %cst_17 {dimension_numbers = #tpu.dot_dimension_numbers<[1], [0], [0], [1], [0, 0, 1, 1], [], []>} : vector<8x128xf32>, vector<128x128xf32>, vector<8x128xf32> -> vector<8x128xf32>
    %29 = vector.extract_strided_slice %0 {offsets = [3, 0], sizes = [1, 128], strides = [1, 1]} : vector<8x128xf32> to vector<1x128xf32>
    %30 = vector.broadcast %29 : vector<1x128xf32> to vector<8x128xf32>
    %31 = arith.addf %28, %30 : vector<8x128xf32>
    %cst_18 = arith.constant 0.000000e+00 : f32
    %32 = vector.broadcast %cst_18 : f32 to vector<8x128xf32>
    %33 = arith.maximumf %31, %32 : vector<8x128xf32>
    %c4 = arith.constant 4 : index
    %c0_19 = arith.constant 0 : index
    %c0_20 = arith.constant 0 : index
    %34 = vector.load %arg2[%c4, %c0_19, %c0_20] : memref<5x128x128xf32, #tpu.memory_space<vmem>>, vector<1x128x128xf32>
    %35 = vector.shape_cast %34 : vector<1x128x128xf32> to vector<128x128xf32>
    %cst_21 = arith.constant dense<0.000000e+00> : vector<8x128xf32>
    %36 = tpu.matmul %33, %35, %cst_21 {dimension_numbers = #tpu.dot_dimension_numbers<[1], [0], [0], [1], [0, 0, 1, 1], [], []>} : vector<8x128xf32>, vector<128x128xf32>, vector<8x128xf32> -> vector<8x128xf32>
    %37 = vector.extract_strided_slice %0 {offsets = [4, 0], sizes = [1, 128], strides = [1, 1]} : vector<8x128xf32> to vector<1x128xf32>
    %38 = vector.broadcast %37 : vector<1x128xf32> to vector<8x128xf32>
    %39 = arith.addf %36, %38 : vector<8x128xf32>
    %c0_22 = arith.constant 0 : index
    %c0_23 = arith.constant 0 : index
    %40 = vector.load %arg4[%c0_22, %c0_23] : memref<8x128xf32, #tpu.memory_space<vmem>>, vector<8x128xf32>
    tpu.vector_store %arg4[%c0_22, %c0_23], %39 {strides = array<i32>} : memref<8x128xf32, #tpu.memory_space<vmem>>, vector<8x128xf32>,
    return
  }
  func.func @transform_0(%arg0: i32) -> (i32, i32) {
    %c0_i32 = arith.constant 0 : i32
    %c0_i32_0 = arith.constant 0 : i32
    return %arg0, %c0_i32 : i32, i32
  }
  func.func @transform_1(%arg0: i32) -> (i32, i32, i32) {
    %c0_i32 = arith.constant 0 : i32
    %c0_i32_0 = arith.constant 0 : i32
    %c0_i32_1 = arith.constant 0 : i32
    %c0_i32_2 = arith.constant 0 : i32
    return %c0_i32, %c0_i32_0, %c0_i32_1 : i32, i32, i32
  }
  func.func @transform_2(%arg0: i32) -> (i32, i32) {
    %c0_i32 = arith.constant 0 : i32
    %c0_i32_0 = arith.constant 0 : i32
    %c0_i32_1 = arith.constant 0 : i32
    return %c0_i32, %c0_i32_0 : i32, i32
  }
  func.func @transform_3(%arg0: i32) -> (i32, i32) {
    %c0_i32 = arith.constant 0 : i32
    %c0_i32_0 = arith.constant 0 : i32
    return %arg0, %c0_i32 : i32, i32
  }
}

</mosaic_0001>

<bundles_post_ra>
// kernel: _net_forward_jit.1
= control target key start
LH: loop header
LB: loop body
LE: loop exit
PB: predicated region body
PF: predicated region fallthrough
CT: control target
= control target key end

     0   :  { %8 = vsyncpa [#allocation3], 0  ;;  %s260_s15 = smov [#allocation2]   ;;  %s261_s17 = smov 128   ;;  %s302_s0 = inlined_call_operand.vmem [shape: f32[8,128], index: 0, kind: input, shape index: {}]   ;;  %s303_s1 = inlined_call_operand.hbm [shape: f32[5,128,128], index: 1, kind: input, shape index: {}]   ;;  %s304_s2 = inlined_call_operand.vmem [shape: f32[8,128], index: 2, kind: input, shape index: {}]   ;;  %s305_s3 = inlined_call_operand.vmem [shape: f32[8,128], index: 3, kind: output, shape index: {}]  }
   0x1   :  { %s15_s14 = sshll.u32 %s303_s1, 4  ;;  %s17_s16 = sshll.u32 %s260_s15, 4  ;;  %s16_s14 = int_to_ptr.hbm [resolvable:$true] %s15_s14  ;;  %s18_s16 = int_to_ptr.vmem [resolvable:$true] %s17_s16 }
   0x2   :  { %s262_s18 = smov 8  }
   0x3   :  { %23 = dma.hbm_to_vmem [thread:$0]  %s16_s14, 10240, %s18_s16, [#allocation3], %s261_s17, %s261_s17, %s262_s18  }
   0x4   :  { %258 = dma.done.wait [#allocation3], 10240  }
   0x5   :  { %259 = vsyncadd [#allocation3], 4294957056  ;;  %v47_v0 = vld [vmem:[#allocation2 + $0x78] sm:$0xff]  ;;  %v46_v1 = vld [vmem:[#allocation2 + $0x70] sm:$0xff] }
   0x6   :  { %49 = vmatpush.msra.mxu0 %v47_v0  ;;  %v45_v2 = vld [vmem:[#allocation2 + $0x68] sm:$0xff]  ;;  %v44_v3 = vld [vmem:[#allocation2 + $0x60] sm:$0xff]  ;;  %v86_v4 = vld [vmem:[#allocation2 + $0xf8] sm:$0xff] }
   0x7   :  { %v43_v5 = vld [vmem:[#allocation2 + $0x58] sm:$0xff]  ;;  %88 = vmatpush.msra.mxu1 %v86_v4  ;;  %v85_v6 = vld [vmem:[#allocation2 + $0xf0] sm:$0xff]  ;;  %v84_v7 = vld [vmem:[#allocation2 + $0xe8] sm:$0xff] }
   0x8   :  { %50 = vmatpush.msra.mxu0 %v46_v1  ;;  %v42_v8 = vld [vmem:[#allocation2 + $0x50] sm:$0xff]  ;;  %v83_v9 = vld [vmem:[#allocation2 + $0xe0] sm:$0xff]  ;;  %v41_v10 = vld [vmem:[#allocation2 + $0x48] sm:$0xff] }
   0x9   :  { %89 = vmatpush.msra.mxu1 %v85_v6  ;;  %v82_v11 = vld [vmem:[#allocation2 + $0xd8] sm:$0xff]  ;;  %v40_v12 = vld [vmem:[#allocation2 + $0x40] sm:$0xff]  ;;  %v81_v13 = vld [vmem:[#allocation2 + $0xd0] sm:$0xff] }
   0xa   :  { %51 = vmatpush.msra.mxu0 %v45_v2  ;;  %v39_v14 = vld [vmem:[#allocation2 + $0x38] sm:$0xff]  ;;  %v80_v15 = vld [vmem:[#allocation2 + $0xc8] sm:$0xff]  ;;  %v38_v16 = vld [vmem:[#allocation2 + $0x30] sm:$0xff] }
   0xb   :  { %90 = vmatpush.msra.mxu1 %v84_v7  ;;  %v79_v17 = vld [vmem:[#allocation2 + $0xc0] sm:$0xff]  ;;  %v37_v18 = vld [vmem:[#allocation2 + $0x28] sm:$0xff]  ;;  %v78_v19 = vld [vmem:[#allocation2 + $0xb8] sm:$0xff] }
   0xc   :  { %52 = vmatpush.msra.mxu0 %v44_v3  ;;  %v36_v20 = vld [vmem:[#allocation2 + $0x20] sm:$0xff]  ;;  %v77_v21 = vld [vmem:[#allocation2 + $0xb0] sm:$0xff]  ;;  %v35_v22 = vld [vmem:[#allocation2 + $0x18] sm:$0xff] }
   0xd   :  { %91 = vmatpush.msra.mxu1 %v83_v9  ;;  %v76_v23 = vld [vmem:[#allocation2 + $0xa8] sm:$0xff]  ;;  %v34_v24 = vld [vmem:[#allocation2 + $0x10] sm:$0xff]  ;;  %v75_v25 = vld [vmem:[#allocation2 + $0xa0] sm:$0xff] }
   0xe   :  { %53 = vmatpush.msra.mxu0 %v43_v5  ;;  %v33_v26 = vld [vmem:[#allocation2 + $0x8] sm:$0xff]  ;;  %v74_v27 = vld [vmem:[#allocation2 + $0x98] sm:$0xff]  ;;  %v32_v28 = vld [vmem:[#allocation2] sm:$0xff] }
   0xf   :  { %92 = vmatpush.msra.mxu1 %v82_v11  ;;  %v31_v29 = vld [vmem:[%s302_s0] sm:$0xff]  ;;  %v73_v30 = vld [vmem:[#allocation2 + $0x90] sm:$0xff]  ;;  %v72_v31 = vld [vmem:[#allocation2 + $0x88] sm:$0xff] }
  0x10   :  { %54 = vmatpush.msra.mxu0 %v42_v8  ;;  %v71_v32 = vld [vmem:[#allocation2 + $0x80] sm:$0xff]  ;;  %v125_v33 = vld [vmem:[#allocation2 + $0x178] sm:$0xff]  ;;  %v124_v34 = vld [vmem:[#allocation2 + $0x170] sm:$0xff] }
  0x11   :  { %93 = vmatpush.msra.mxu1 %v81_v13  ;;  %127 = vmatpush.msra.mxu2 %v125_v33  ;;  %v123_v35 = vld [vmem:[#allocation2 + $0x168] sm:$0xff]  ;;  %v122_v36 = vld [vmem:[#allocation2 + $0x160] sm:$0xff]  ;;  %v121_v37 = vld [vmem:[#allocation2 + $0x158] sm:$0xff] }
  0x12   :  { %55 = vmatpush.msra.mxu0 %v41_v10  ;;  %v120_v38 = vld [vmem:[#allocation2 + $0x150] sm:$0xff]  ;;  %v119_v39 = vld [vmem:[#allocation2 + $0x148] sm:$0xff]  ;;  %v118_v40 = vld [vmem:[#allocation2 + $0x140] sm:$0xff] }
  0x13   :  { %94 = vmatpush.msra.mxu1 %v80_v15  ;;  %128 = vmatpush.msra.mxu2 %v124_v34  ;;  %v117_v41 = vld [vmem:[#allocation2 + $0x138] sm:$0xff]  ;;  %v116_v42 = vld [vmem:[#allocation2 + $0x130] sm:$0xff]  ;;  %v115_v43 = vld [vmem:[#allocation2 + $0x128] sm:$0xff] }
  0x14   :  { %56 = vmatpush.msra.mxu0 %v40_v12  ;;  %v114_v44 = vld [vmem:[#allocation2 + $0x120] sm:$0xff]  ;;  %v113_v46 = vld [vmem:[#allocation2 + $0x118] sm:$0xff]  ;;  %v112_v51 = vld [vmem:[#allocation2 + $0x110] sm:$0xff] }
  0x15   :  { %95 = vmatpush.msra.mxu1 %v79_v17  ;;  %129 = vmatpush.msra.mxu2 %v123_v35  ;;  %v292_v45 = vld [vmem:[%s304_s2] sm:$0xff]  ;;  %v111_v52 = vld [vmem:[#allocation2 + $0x108] sm:$0xff]  ;;  %v164_v54 = vld [vmem:[#allocation2 + $0x1f8] sm:$0xff] }
  0x16   :  { %57 = vmatpush.msra.mxu0 %v39_v14  ;;  %v48_v47 = vperm.slane %v292_v45, 0  ;;  %v110_v53 = vld [vmem:[#allocation2 + $0x100] sm:$0xff]  ;;  %v163_v55 = vld [vmem:[#allocation2 + $0x1f0] sm:$0xff]  ;;  %166 = vmatpush.msra.mxu3 %v164_v54  ;;  %v162_v56 = vld [vmem:[#allocation2 + $0x1e8] sm:$0xff]  ;;  %v87_v3 = vperm.slane %v292_v45, 1  ;;  %v204_v34 = vperm.slane %v292_v45, 4 }
  0x17   :  { %96 = vmatpush.msra.mxu1 %v78_v19  ;;  %130 = vmatpush.msra.mxu2 %v122_v36  ;;  %v161_v57 = vld [vmem:[#allocation2 + $0x1e0] sm:$0xff]  ;;  %v160_v58 = vld [vmem:[#allocation2 + $0x1d8] sm:$0xff]  ;;  %v159_v59 = vld [vmem:[#allocation2 + $0x1d0] sm:$0xff] }
  0x18   :  { %58 = vmatpush.msra.mxu0 %v38_v16  ;;  %167 = vmatpush.msra.mxu3 %v163_v55  ;;  %v158_v60 = vld [vmem:[#allocation2 + $0x1c8] sm:$0xff]  ;;  %v157_v61 = vld [vmem:[#allocation2 + $0x1c0] sm:$0xff]  ;;  %v156_v62 = vld [vmem:[#allocation2 + $0x1b8] sm:$0xff] }
  0x19   :  { %97 = vmatpush.msra.mxu1 %v77_v21  ;;  %131 = vmatpush.msra.mxu2 %v121_v37  ;;  %v155_v63 = vld [vmem:[#allocation2 + $0x1b0] sm:$0xff]  ;;  %v154_v0 = vld [vmem:[#allocation2 + $0x1a8] sm:$0xff]  ;;  %v153_v1 = vld [vmem:[#allocation2 + $0x1a0] sm:$0xff] }
  0x1a   :  { %59 = vmatpush.msra.mxu0 %v37_v18  ;;  %168 = vmatpush.msra.mxu3 %v162_v56  ;;  %v152_v2 = vld [vmem:[#allocation2 + $0x198] sm:$0xff]  ;;  %v151_v7 = vld [vmem:[#allocation2 + $0x190] sm:$0xff]  ;;  %v150_v8 = vld [vmem:[#allocation2 + $0x188] sm:$0xff] }
  0x1b   :  { %98 = vmatpush.msra.mxu1 %v76_v23  ;;  %132 = vmatpush.msra.mxu2 %v120_v38  ;;  %v149_v9 = vld [vmem:[#allocation2 + $0x180] sm:$0xff]  ;;  %v203_v10 = vld [vmem:[#allocation2 + $0x278] sm:$0xff]  ;;  %v202_v11 = vld [vmem:[#allocation2 + $0x270] sm:$0xff]  ;;  %v126_v23 = vperm.slane %v292_v45, 2 }
  0x1c   :  { %60 = vmatpush.msra.mxu0 %v36_v20  ;;  %169 = vmatpush.msra.mxu3 %v161_v57  ;;  %v201_v12 = vld [vmem:[#allocation2 + $0x268] sm:$0xff]  ;;  %v200_v13 = vld [vmem:[#allocation2 + $0x260] sm:$0xff]  ;;  %v199_v14 = vld [vmem:[#allocation2 + $0x258] sm:$0xff] }
  0x1d   :  { %99 = vmatpush.msra.mxu1 %v75_v25  ;;  %133 = vmatpush.msra.mxu2 %v119_v39  ;;  %v198_v15 = vld [vmem:[#allocation2 + $0x250] sm:$0xff]  ;;  %v197_v16 = vld [vmem:[#allocation2 + $0x248] sm:$0xff]  ;;  %v196_v17 = vld [vmem:[#allocation2 + $0x240] sm:$0xff] }
  0x1e   :  { %61 = vmatpush.msra.mxu0 %v35_v22  ;;  %170 = vmatpush.msra.mxu3 %v160_v58  ;;  %v195_v18 = vld [vmem:[#allocation2 + $0x238] sm:$0xff]  ;;  %v194_v19 = vld [vmem:[#allocation2 + $0x230] sm:$0xff]  ;;  %v193_v20 = vld [vmem:[#allocation2 + $0x228] sm:$0xff] }
  0x1f   :  { %100 = vmatpush.msra.mxu1 %v74_v27  ;;  %134 = vmatpush.msra.mxu2 %v118_v40  ;;  %v192_v21 = vld [vmem:[#allocation2 + $0x220] sm:$0xff]  ;;  %v191_v22 = vld [vmem:[#allocation2 + $0x218] sm:$0xff]  ;;  %v190_v27 = vld [vmem:[#allocation2 + $0x210] sm:$0xff] }
  0x20   :  { %62 = vmatpush.msra.mxu0 %v34_v24  ;;  %171 = vmatpush.msra.mxu3 %v159_v59 }
  0x21   :  { %101 = vmatpush.msra.mxu1 %v73_v30  ;;  %135 = vmatpush.msra.mxu2 %v117_v41  ;;  %v165_v30 = vperm.slane %v292_v45, 3 }
  0x22   :  { %63 = vmatpush.msra.mxu0 %v33_v26  ;;  %172 = vmatpush.msra.mxu3 %v158_v60 }
  0x23   :  { %102 = vmatpush.msra.mxu1 %v72_v31  ;;  %136 = vmatpush.msra.mxu2 %v116_v42 }
  0x24   :  { %64 = vmatpush.msra.mxu0 %v32_v28  ;;  %173 = vmatpush.msra.mxu3 %v157_v61  ;;  %v189_v28 = vld [vmem:[#allocation2 + $0x208] sm:$0xff] }
  0x25   :  { %65 = vmatmul.f32.vlgmr.msra.gmra.mxu0 %v31_v29  ;;  %103 = vmatpush.msra.mxu1 %v71_v32  ;;  %v188_v29 = vld [vmem:[#allocation2 + $0x200] sm:$0xff] }
  0x26   :  { %137 = vmatpush.msra.mxu2 %v115_v43  ;;  %174 = vmatpush.msra.mxu3 %v156_v62 }
  0x27   :  { %205 = vmatpush.msrb.mxu0 %v203_v10 }
  0x28   :  { %138 = vmatpush.msra.mxu2 %v114_v44  ;;  %175 = vmatpush.msra.mxu3 %v155_v63 }
  0x29   :  { %206 = vmatpush.msrb.mxu0 %v202_v11 }
  0x2a   :  { %139 = vmatpush.msra.mxu2 %v113_v46  ;;  %176 = vmatpush.msra.mxu3 %v154_v0 }
  0x2b   :  { %207 = vmatpush.msrb.mxu0 %v201_v12 }
  0x2c   :  { %140 = vmatpush.msra.mxu2 %v112_v51  ;;  %177 = vmatpush.msra.mxu3 %v153_v1 }
  0x2d   :  { %208 = vmatpush.msrb.mxu0 %v200_v13 }
  0x2e   :  { %141 = vmatpush.msra.mxu2 %v111_v52  ;;  %178 = vmatpush.msra.mxu3 %v152_v2 }
  0x2f   :  { %209 = vmatpush.msrb.mxu0 %v199_v14 }
  0x30   :  { %142 = vmatpush.msra.mxu2 %v110_v53  ;;  %179 = vmatpush.msra.mxu3 %v151_v7 }
  0x31   :  { %210 = vmatpush.msrb.mxu0 %v198_v15 }
  0x32   :  { %180 = vmatpush.msra.mxu3 %v150_v8 }
  0x33   :  { %211 = vmatpush.msrb.mxu0 %v197_v16 }
  0x34   :  { %181 = vmatpush.msra.mxu3 %v149_v9 }
  0x35   :  { %212 = vmatpush.msrb.mxu0 %v196_v17 }
  0x37   :  { %213 = vmatpush.msrb.mxu0 %v195_v18 }
  0x39   :  { %214 = vmatpush.msrb.mxu0 %v194_v19 }
  0x3b   :  { %215 = vmatpush.msrb.mxu0 %v193_v20 }
  0x3d   :  { %216 = vmatpush.msrb.mxu0 %v192_v21 }
  0x3f   :  { %217 = vmatpush.msrb.mxu0 %v191_v22 }
  0x41   :  { %218 = vmatpush.msrb.mxu0 %v190_v27 }
  0x43   :  { %219 = vmatpush.msrb.mxu0 %v189_v28 }
  0x45   :  { %220 = vmatpush.msrb.mxu0 %v188_v29 }
  0xa2   :  { %v66_v48 = vpop.f32.mrf.mxu0 }
  0xa3   :  { %v67_v49 = vadd.f32 %v66_v48, %v48_v47 }
  0xa5   :  { %v69_v50 = vmax.f32 %v67_v49, 0.0 }
  0xa7   :  { %104 = vmatmul.f32.vlgmr.msra.gmra.mxu1 %v69_v50 }
 0x124   :  { %v105_v4 = vpop.f32.mrf.mxu1 }
 0x125   :  { %v106_v5 = vadd.f32 %v105_v4, %v87_v3 }
 0x127   :  { %v108_v6 = vmax.f32 %v106_v5, 0.0 }
 0x129   :  { %143 = vmatmul.f32.vlgmr.msra.gmra.mxu2 %v108_v6 }
 0x1ac   :  { %v144_v24 = vpop.f32.mrf.mxu2 }
 0x1ad   :  { %v145_v25 = vadd.f32 %v144_v24, %v126_v23 }
 0x1af   :  { %v147_v26 = vmax.f32 %v145_v25, 0.0 }
 0x1b1   :  { %182 = vmatmul.f32.vlgmr.msra.gmra.mxu3 %v147_v26 }
 0x234   :  { %v183_v31 = vpop.f32.mrf.mxu3 }
 0x235   :  { %v184_v32 = vadd.f32 %v183_v31, %v165_v30 }
 0x237   :  { %v186_v33 = vmax.f32 %v184_v32, 0.0 }
 0x239   :  { %221 = vmatmul.f32.vlgmr.msrb.gmra.mxu0 %v186_v33 }
 0x2b6   :  { %v222_v35 = vpop.f32.mrf.mxu0 }
 0x2b7   :  { %v223_v36 = vadd.f32 %v222_v35, %v204_v34 }
 0x2b9   :  { %225 = vst [vmem:[%s305_s3] sm:$0xff] %v223_v36 }
 0x2ba   :  { %230 = vsyncpa [#allocation3], 1 }

</bundles_post_ra>
